<compile_context>
chip_gen: v5e
topology: v5e:2x2
jax: 0.10.0
libtpu: 0.0.40
codegen_flags: <defaults>
</compile_context>

<pallas_src>
import jax
import jax.numpy as jnp
from jax import lax
from jax.experimental import pallas as pl
from jax.experimental.pallas import tpu as pltpu


def _round_up(n: int, m: int) -> int:
    return ((n + m - 1) // m) * m


def _linear_mxu_kernel(x_ref, m_ref, b_ref, o_ref):
    """One batch tile of y = x_packed @ M + b.

    x_ref: (TR, 128) VMEM tile: 128//F samples per row, features interleaved on lanes.
    m_ref: (128, S)  selection-weight matrix, S = 128//F, M[s*F + f, s] = w_f.
    b_ref: (1,)      f32 bias in SMEM.
    o_ref: (TR, S)   one result per packed sample (dense, in sample order).
    """
    y = jnp.dot(x_ref[...], m_ref[...],
                preferred_element_type=jnp.float32,
                precision=lax.Precision.HIGHEST)
    o_ref[...] = (y + b_ref[0]).astype(o_ref.dtype)


def _linear_pallas_packed(x, w_vec, b_vec, *, block_rows, core_parallel):
    """Pallas path for x whose flat length (B*F) is a multiple of 128."""
    B, F = x.shape
    S = 128 // F                      # samples packed per 128-lane row
    R = (B * F) // 128                # packed rows

    # Zero-copy layout: row-major (B, F) -> (R, 128). No transpose, no pad, no copy.
    x_rs = x.reshape(R, 128)

    # Tiny constant (128, S) matrix folding the weights and the lane de-interleave:
    # M[s*F + f, s] = w_f, zeros elsewhere.
    eye = jnp.eye(S, dtype=jnp.float32)
    m = (eye[:, None, :] * w_vec[None, :, None]).reshape(S * F, S)

    # MiB-scale row tile (multiple of 8 sublanes). Ragged last tile handled by cdiv grid.
    tr = min(block_rows, _round_up(R, 8))
    grid = (pl.cdiv(R, tr),)

    # On v7x, CORE_PARALLEL actually shards the batch grid across the 2 TensorCores;
    # plain PARALLEL is the safe default on single-TC v5e/v6e.
    batch_sem = pltpu.CORE_PARALLEL if core_parallel else pltpu.PARALLEL

    out = pl.pallas_call(
        _linear_mxu_kernel,
        out_shape=jax.ShapeDtypeStruct((R, S), jnp.float32),
        grid=grid,
        in_specs=[
            pl.BlockSpec((tr, 128), lambda i: (i, 0)),             # x tile (double-buffered)
            pl.BlockSpec((128, S), lambda i: (0, 0)),              # M: fetched once, reused
            pl.BlockSpec(memory_space=pltpu.MemorySpace.SMEM),     # bias scalar
        ],
        out_specs=pl.BlockSpec((tr, S), lambda i: (i, 0)),         # dense, in-order results
        compiler_params=pltpu.CompilerParams(
            dimension_semantics=(batch_sem,),
            vmem_limit_bytes=32 * 1024 * 1024,   # ~6 MiB used at tr=4096; safe on v7x's 64 MiB
        ),
    )(x_rs, m, b_vec)

    # (R, S) row-major is already y_0 .. y_{B-1}: this reshape is free.
    return out.reshape(B, 1)


def linear_net_forward_pallas(x, w, b, *, block_rows: int = 4096, core_parallel: bool = False):
    """Pallas GEMV path. x: (B, F), w: F weights (any shape), b: 1 bias -> (B, 1) f32."""
    B, F = x.shape
    assert 128 % F == 0, "Pallas path packs 128//F samples per lane row; use the XLA path otherwise"

    x = x.astype(jnp.float32)
    w_vec = jnp.reshape(w, (-1,)).astype(jnp.float32)     # (F,)  (PyTorch stores (out, in))
    b_vec = jnp.reshape(b, (-1,)).astype(jnp.float32)     # (1,)
    assert w_vec.shape == (F,) and b_vec.shape == (1,)

    S = 128 // F
    b_main = (B // S) * S
    if b_main == 0:                                       # tiny batch: not worth a launch
        return (x * w_vec[None, :]).sum(axis=1, keepdims=True) + b_vec[0]
    if b_main == B:
        return _linear_pallas_packed(x, w_vec, b_vec,
                                     block_rows=block_rows, core_parallel=core_parallel)
    # Ragged batch: bulk through Pallas, the < S-row tail through fused XLA.  This is
    # cheaper than padding x (which would copy the whole input just to round up B).
    y_main = _linear_pallas_packed(x[:b_main], w_vec, b_vec,
                                   block_rows=block_rows, core_parallel=core_parallel)
    y_tail = (x[b_main:] * w_vec[None, :]).sum(axis=1, keepdims=True) + b_vec[0]
    return jnp.concatenate([y_main, y_tail], axis=0)


def linear_net_forward(x, w, b, *, min_pallas_batch: int = 65536, core_parallel: bool = False):
    """LinearNet.forward.  Below the (deliberately high) crossover batch size the whole op is
    a few KiB of HBM traffic and fused XLA is already at roofline, so Pallas is skipped."""
    B, F = x.shape
    w_vec = jnp.reshape(w, (-1,)).astype(jnp.float32)
    b_vec = jnp.reshape(b, (-1,)).astype(jnp.float32)
    if B < min_pallas_batch or 128 % F != 0:
        # TODO(synk): F not dividing 128 needs a different lane packing; fused XLA handles it.
        return (x.astype(jnp.float32) * w_vec[None, :]).sum(axis=1, keepdims=True) + b_vec[0]
    return linear_net_forward_pallas(x, w, b, core_parallel=core_parallel)


if __name__ == "__main__":
    key = jax.random.PRNGKey(0)
    kx, kw, kx2 = jax.random.split(key, 3)

    n_feature = 2  # num_inputs in the original script

    # Parameters (analogue of init.normal_(weight, 0, 0.01)); bias made nonzero so the
    # bias-add path is actually exercised (the original init sets it to constant 0).
    w = 0.01 * jax.random.normal(kw, (1, n_feature), dtype=jnp.float32)  # PyTorch (out, in)
    b = jnp.array([0.25], dtype=jnp.float32)

    # 1) Exercise the Pallas kernel at a batch large enough to be worth a launch.
    batch = 1024
    x = jax.random.normal(kx, (batch, n_feature), dtype=jnp.float32)
    y = jax.block_until_ready(linear_net_forward_pallas(x, w, b))
    # Exact f32 reference (elementwise mul + sum, no MXU), tolerance leaves margin for
    # the MXU's f32 pass decomposition while still catching any structural error (>=1e-2).
    y_ref = (x * w.reshape(1, n_feature)).sum(axis=1, keepdims=True) + b[0]
    assert y.shape == (batch, 1)
    assert jnp.allclose(y, y_ref, atol=1e-4), "Pallas path mismatch vs reference"

    # 2) The original script's shipped shape (mini-batches of 10 rows, 2 features):
    #    dispatches to fused XLA -- a Pallas launch is pure overhead at this size.
    x_small = jax.random.normal(kx2, (10, n_feature), dtype=jnp.float32)
    y_small = jax.block_until_ready(linear_net_forward(x_small, w, b))
    y_small_ref = (x_small * w.reshape(1, n_feature)).sum(axis=1, keepdims=True) + b[0]
    assert y_small.shape == (10, 1)
    assert jnp.allclose(y_small, y_small_ref, atol=1e-5), "fallback path mismatch"

    print("KERNEL_OK")
</pallas_src>

<mosaic_0001>
module attributes {stable_mosaic.version = 11 : i64} {
  func.func @_linear_mxu_kernel(%arg0: i32, %arg1: memref<16x128xf32, #tpu.memory_space<vmem>>, %arg2: memref<128x64xf32, #tpu.memory_space<vmem>>, %arg3: memref<1xf32, #tpu.memory_space<smem>>, %arg4: memref<16x64xf32, #tpu.memory_space<vmem>>) attributes {dimension_semantics = [#tpu.dimension_semantics<parallel>], iteration_bounds = array<i64: 1>, scalar_prefetch = 0 : i64, scratch_operands = 0 : i64, tpu.core_type = #tpu.core_type<tc>, window_params = [{transform_indices = @transform_0, window_bounds = array<i64: 16, 128>}, {pipeline_mode = #tpu.pipeline_mode<synchronous>, transform_indices = @transform_1, window_bounds = array<i64: 128, 64>}, {transform_indices = @transform_2, window_bounds = array<i64: 1>}, {transform_indices = @transform_3, window_bounds = array<i64: 16, 64>}]} {
    %c0 = arith.constant 0 : index
    %c0_0 = arith.constant 0 : index
    %0 = vector.load %arg1[%c0, %c0_0] : memref<16x128xf32, #tpu.memory_space<vmem>>, vector<16x128xf32>
    %c0_1 = arith.constant 0 : index
    %c0_2 = arith.constant 0 : index
    %1 = vector.load %arg2[%c0_1, %c0_2] : memref<128x64xf32, #tpu.memory_space<vmem>>, vector<128x64xf32>
    %cst = arith.constant dense<0.000000e+00> : vector<16x64xf32>
    %2 = tpu.matmul %0, %1, %cst {dimension_numbers = #tpu.dot_dimension_numbers<[1], [0], [0], [1], [0, 0, 1, 1], [], []>, precision = #tpu.contract_precision<fp32>} : vector<16x128xf32>, vector<128x64xf32>, vector<16x64xf32> -> vector<16x64xf32>
    %c0_3 = arith.constant 0 : index
    %3 = memref.load %arg3[%c0_3] : memref<1xf32, #tpu.memory_space<smem>>
    %4 = vector.broadcast %3 : f32 to vector<16x64xf32>
    %5 = arith.addf %2, %4 : vector<16x64xf32>
    %c0_4 = arith.constant 0 : index
    %c0_5 = arith.constant 0 : index
    %6 = vector.load %arg4[%c0_4, %c0_5] : memref<16x64xf32, #tpu.memory_space<vmem>>, vector<16x64xf32>
    tpu.vector_store %arg4[%c0_4, %c0_5], %5 {strides = array<i32>} : memref<16x64xf32, #tpu.memory_space<vmem>>, vector<16x64xf32>,
    return
  }
  func.func @transform_0(%arg0: i32) -> (i32, i32) {
    %c0_i32 = arith.constant 0 : i32
    %c0_i32_0 = arith.constant 0 : i32
    return %arg0, %c0_i32 : i32, i32
  }
  func.func @transform_1(%arg0: i32) -> (i32, i32) {
    %c0_i32 = arith.constant 0 : i32
    %c0_i32_0 = arith.constant 0 : i32
    %c0_i32_1 = arith.constant 0 : i32
    return %c0_i32, %c0_i32_0 : i32, i32
  }
  func.func @transform_2(%arg0: i32) -> i32 {
    %c0_i32 = arith.constant 0 : i32
    %c0_i32_0 = arith.constant 0 : i32
    return %c0_i32 : i32
  }
  func.func @transform_3(%arg0: i32) -> (i32, i32) {
    %c0_i32 = arith.constant 0 : i32
    %c0_i32_0 = arith.constant 0 : i32
    return %arg0, %c0_i32 : i32, i32
  }
}

</mosaic_0001>

<bundles_post_ra>
// kernel: tpu_custom_call.1
= control target key start
LH: loop header
LB: loop body
LE: loop exit
PB: predicated region body
PF: predicated region fallthrough
CT: control target
= control target key end

     0   :  { %s777_s0 = inlined_call_operand.vmem [shape: f32[16,128], index: 0, kind: input, shape index: {}]   ;;  %s778_s1 = inlined_call_operand.vmem [shape: f32[128,64], index: 1, kind: input, shape index: {}]   ;;  %s779_s2 = inlined_call_operand.<no memory space> [shape: f32[1], index: 2, kind: input, shape index: {}]   ;;  %s780_s3 = inlined_call_operand.hbm [shape: f32[16,64], index: 3, kind: output, shape index: {}]  }
   0x1   :  { %v33_v0 = vld [vmem:[%s778_s1 + $0x78] sm:$0xff]  ;;  %v32_v1 = vld [vmem:[%s778_s1 + $0x70] sm:$0xff]  ;;  %v31_v2 = vld [vmem:[%s778_s1 + $0x68] sm:$0xff] }
   0x2   :  { %v522_v3 = vand.u32 4294901760, %v33_v0  ;;  %v524_v4 = vand.u32 4294901760, %v32_v1  ;;  %v526_v5 = vand.u32 4294901760, %v31_v2  ;;  %v30_v6 = vld [vmem:[%s778_s1 + $0x60] sm:$0xff]  ;;  %v29_v7 = vld [vmem:[%s778_s1 + $0x58] sm:$0xff]  ;;  %v28_v8 = vld [vmem:[%s778_s1 + $0x50] sm:$0xff] }
   0x3   :  { %v537_v9 = vand.u32 4294901760, %v30_v6  ;;  %v539_v10 = vand.u32 4294901760, %v29_v7  ;;  %v541_v11 = vand.u32 4294901760, %v28_v8  ;;  %v27_v12 = vld [vmem:[%s778_s1 + $0x48] sm:$0xff]  ;;  %v26_v13 = vld [vmem:[%s778_s1 + $0x40] sm:$0xff]  ;;  %v25_v18 = vld [vmem:[%s778_s1 + $0x38] sm:$0xff] }
   0x4   :  { %37 = vmatpush.msra.mxu0 %v522_v3  ;;  %v86_v14 = vsub.f32 %v33_v0, %v522_v3  ;;  %v92_v15 = vsub.f32 %v32_v1, %v524_v4  ;;  %250 = vmatpush.msra.mxu3 %v522_v3  ;;  %v98_v16 = vsub.f32 %v31_v2, %v526_v5  ;;  %v554_v17 = vand.u32 4294901760, %v27_v12  ;;  %v24_v26 = vld [vmem:[%s778_s1 + $0x30] sm:$0xff] }
   0x5   :  { %v104_v19 = vsub.f32 %v30_v6, %v537_v9  ;;  %v110_v20 = vsub.f32 %v29_v7, %v539_v10  ;;  %v561_v21 = vand.u32 4294901760, %v26_v13  ;;  %v116_v25 = vsub.f32 %v28_v8, %v541_v11 }
   0x6   :  { %39 = vmatpush.msra.mxu0 %v524_v4  ;;  %192 = vmatpush.msra.mxu2 %v86_v14  ;;  %v564_v22 = vand.u32 4294901760, %v86_v14  ;;  %v566_v23 = vand.u32 4294901760, %v92_v15  ;;  %v568_v24 = vand.u32 4294901760, %v98_v16 }
   0x7   :  { %9 = vsyncpa [#allocation4], 0  ;;  %252 = vmatpush.msra.mxu3 %v524_v4  ;;  %v575_v27 = vand.u32 4294901760, %v104_v19  ;;  %v122_v28 = vsub.f32 %v27_v12, %v554_v17  ;;  %v578_v29 = vand.u32 4294901760, %v25_v18  ;;  %v584_v33 = vand.u32 4294901760, %v110_v20  ;;  %v23_v36 = vld [vmem:[%s778_s1 + $0x28] sm:$0xff] }
   0x8   :  { %41 = vmatpush.msra.mxu0 %v526_v5  ;;  %195 = vmatpush.msra.mxu2 %v92_v15  ;;  %v88_v30 = vsub.f32 %v86_v14, %v564_v22  ;;  %v94_v31 = vsub.f32 %v92_v15, %v566_v23  ;;  %v100_v32 = vsub.f32 %v98_v16, %v568_v24  ;;  %v588_v35 = vand.u32 4294901760, %v24_v26  ;;  %v22_v42 = vld [vmem:[%s778_s1 + $0x20] sm:$0xff]  ;;  %v21_v48 = vld [vmem:[%s778_s1 + $0x18] sm:$0xff]  ;;  %v20_v54 = vld [vmem:[%s778_s1 + $0x10] sm:$0xff]  ;;  %s490_s21 = smov [#allocation3]   ;;  %s491_s25 = smov 128  }
   0x9   :  { %254 = vmatpush.msra.mxu3 %v526_v5  ;;  %v128_v34 = vsub.f32 %v26_v13, %v561_v21  ;;  %v106_v39 = vsub.f32 %v104_v19, %v575_v27  ;;  %v595_v40 = vand.u32 4294901760, %v116_v25  ;;  %v598_v41 = vand.u32 4294901760, %v122_v28  ;;  %v19_v60 = vld [vmem:[%s778_s1 + $0x8] sm:$0xff]  ;;  %v18_v2 = vld [vmem:[%s778_s1] sm:$0xff]  ;;  %s415_s22 = sshll.u32 %s490_s21, 4  ;;  %s492_s26 = smov 8   ;;  %s416_s22 = int_to_ptr.vmem [resolvable:$true] %s415_s22 }
   0xa   :  { %43 = vmatpush.msra.mxu0 %v537_v9  ;;  %198 = vmatpush.msra.mxu2 %v98_v16  ;;  %v89_v37 = vand.u32 4294901760, %v88_v30  ;;  %v95_v38 = vand.u32 4294901760, %v94_v31  ;;  %v101_v43 = vand.u32 4294901760, %v100_v32  ;;  %v112_v44 = vsub.f32 %v110_v20, %v584_v33 }
   0xb   :  { %256 = vmatpush.msra.mxu3 %v537_v9  ;;  %v134_v45 = vsub.f32 %v25_v18, %v578_v29  ;;  %v606_v46 = vand.u32 4294901760, %v23_v36  ;;  %v609_v47 = vand.u32 4294901760, %v128_v34  ;;  %v107_v49 = vand.u32 4294901760, %v106_v39 }
   0xc   :  { %45 = vmatpush.msra.mxu0 %v539_v10  ;;  %90 = vmatpush.msra.mxu1 %v89_v37  ;;  %v118_v50 = vsub.f32 %v116_v25, %v595_v40  ;;  %v140_v51 = vsub.f32 %v24_v26, %v588_v35  ;;  %v617_v52 = vand.u32 4294901760, %v22_v42  ;;  %v124_v53 = vsub.f32 %v122_v28, %v598_v41 }
   0xd   :  { %201 = vmatpush.msra.mxu2 %v104_v19  ;;  %258 = vmatpush.msra.mxu3 %v539_v10  ;;  %v113_v55 = vand.u32 4294901760, %v112_v44  ;;  %v146_v56 = vsub.f32 %v23_v36, %v606_v46  ;;  %v626_v57 = vand.u32 4294901760, %v21_v48  ;;  %v628_v58 = vand.u32 4294901760, %v134_v45 }
   0xe   :  { %47 = vmatpush.msra.mxu0 %v541_v11  ;;  %96 = vmatpush.msra.mxu1 %v95_v38  ;;  %v130_v59 = vsub.f32 %v128_v34, %v609_v47  ;;  %v119_v61 = vand.u32 4294901760, %v118_v50  ;;  %v152_v62 = vsub.f32 %v22_v42, %v617_v52  ;;  %v637_v63 = vand.u32 4294901760, %v20_v54  ;;  %v16_v38 = vld [vmem:[%s777_s0] sm:$0xff] }
   0xf   :  { %204 = vmatpush.msra.mxu2 %v110_v20  ;;  %260 = vmatpush.msra.mxu3 %v541_v11  ;;  %v639_v0 = vand.u32 4294901760, %v140_v51  ;;  %v125_v1 = vand.u32 4294901760, %v124_v53  ;;  %v136_v6 = vsub.f32 %v134_v45, %v628_v58  ;;  %v158_v7 = vsub.f32 %v21_v48, %v626_v57 }
  0x10   :  { %49 = vmatpush.msra.mxu0 %v554_v17  ;;  %102 = vmatpush.msra.mxu1 %v101_v43  ;;  %v648_v8 = vand.u32 4294901760, %v19_v60  ;;  %v650_v12 = vand.u32 4294901760, %v146_v56  ;;  %v131_v13 = vand.u32 4294901760, %v130_v59  ;;  %v164_v15 = vsub.f32 %v20_v54, %v637_v63 }
  0x11   :  { %207 = vmatpush.msra.mxu2 %v116_v25  ;;  %262 = vmatpush.msra.mxu3 %v554_v17  ;;  %v142_v14 = vsub.f32 %v140_v51, %v639_v0  ;;  %v656_v16 = vand.u32 4294901760, %v18_v2  ;;  %v658_v18 = vand.u32 4294901760, %v152_v62  ;;  %v137_v19 = vand.u32 4294901760, %v136_v6 }
  0x12   :  { %51 = vmatpush.msra.mxu0 %v561_v21  ;;  %108 = vmatpush.msra.mxu1 %v107_v49  ;;  %v148_v20 = vsub.f32 %v146_v56, %v650_v12  ;;  %v170_v25 = vsub.f32 %v19_v60, %v648_v8  ;;  %v664_v26 = vand.u32 4294901760, %v158_v7  ;;  %v670_v32 = vand.u32 4294901760, %v164_v15 }
  0x13   :  { %210 = vmatpush.msra.mxu2 %v122_v28  ;;  %264 = vmatpush.msra.mxu3 %v561_v21  ;;  %v143_v28 = vand.u32 4294901760, %v142_v14  ;;  %v154_v30 = vsub.f32 %v152_v62, %v658_v18  ;;  %v176_v31 = vsub.f32 %v18_v2, %v656_v16  ;;  %v686_v44 = vand.u32 4294901760, %v16_v38 }
  0x14   :  { %53 = vmatpush.msra.mxu0 %v578_v29  ;;  %114 = vmatpush.msra.mxu1 %v113_v55  ;;  %v160_v36 = vsub.f32 %v158_v7, %v664_v26  ;;  %v675_v37 = vand.u32 4294901760, %v170_v25  ;;  %v166_v42 = vsub.f32 %v164_v15, %v670_v32  ;;  %v17_v55 = vld [vmem:[%s777_s0 + $0x8] sm:$0xff]  ;;  %vm408_vm0 = vcmask 523264  }
  0x15   :  { %213 = vmatpush.msra.mxu2 %v128_v34  ;;  %266 = vmatpush.msra.mxu3 %v578_v29  ;;  %v149_v34 = vand.u32 4294901760, %v148_v20  ;;  %v155_v39 = vand.u32 4294901760, %v154_v30  ;;  %v683_v43 = vand.u32 4294901760, %v176_v31  ;;  %v706_v59 = vand.u32 4294901760, %v17_v55 }
  0x16   :  { %55 = vmatpush.msra.mxu0 %v588_v35  ;;  %120 = vmatpush.msra.mxu1 %v119_v61  ;;  %v172_v48 = vsub.f32 %v170_v25, %v675_v37  ;;  %v167_v49 = vand.u32 4294901760, %v166_v42 }
  0x17   :  { %216 = vmatpush.msra.mxu2 %v134_v45  ;;  %268 = vmatpush.msra.mxu3 %v588_v35  ;;  %v161_v45 = vand.u32 4294901760, %v160_v36  ;;  %v178_v50 = vsub.f32 %v176_v31, %v683_v43 }
  0x18   :  { %57 = vmatpush.msra.mxu0 %v606_v46  ;;  %126 = vmatpush.msra.mxu1 %v125_v1  ;;  %v173_v53 = vand.u32 4294901760, %v172_v48 }
  0x19   :  { %219 = vmatpush.msra.mxu2 %v140_v51  ;;  %270 = vmatpush.msra.mxu3 %v606_v46  ;;  %v69_v51 = vsub.f32 %v16_v38, %v686_v44  ;;  %v179_v54 = vand.u32 4294901760, %v178_v50 }
  0x1a   :  { %59 = vmatpush.msra.mxu0 %v617_v52  ;;  %132 = vmatpush.msra.mxu1 %v131_v13 }
  0x1b   :  { %222 = vmatpush.msra.mxu2 %v146_v56  ;;  %272 = vmatpush.msra.mxu3 %v617_v52  ;;  %v70_v56 = vand.u32 4294901760, %v69_v51 }
  0x1c   :  { %61 = vmatpush.msra.mxu0 %v626_v57  ;;  %138 = vmatpush.msra.mxu1 %v137_v19 }
  0x1d   :  { %225 = vmatpush.msra.mxu2 %v152_v62  ;;  %274 = vmatpush.msra.mxu3 %v626_v57 }
  0x1e   :  { %63 = vmatpush.msra.mxu0 %v637_v63  ;;  %144 = vmatpush.msra.mxu1 %v143_v28 }
  0x1f   :  { %228 = vmatpush.msra.mxu2 %v158_v7  ;;  %276 = vmatpush.msra.mxu3 %v637_v63 }
  0x20   :  { %65 = vmatpush.msra.mxu0 %v648_v8  ;;  %150 = vmatpush.msra.mxu1 %v149_v34 }
  0x21   :  { %231 = vmatpush.msra.mxu2 %v164_v15  ;;  %278 = vmatpush.msra.mxu3 %v648_v8 }
  0x22   :  { %67 = vmatpush.msra.mxu0 %v656_v16  ;;  %156 = vmatpush.msra.mxu1 %v155_v39 }
  0x23   :  { %234 = vmatpush.msra.mxu2 %v170_v25  ;;  %280 = vmatpush.msra.mxu3 %v656_v16 }
  0x24   :  { %297 = vmatpush.msrb.mxu0 %v564_v22  ;;  %162 = vmatpush.msra.mxu1 %v161_v45 }
  0x25   :  { %237 = vmatpush.msra.mxu2 %v176_v31  ;;  %445 = vmatpush.msrb.mxu3 %v522_v3 }
  0x26   :  { %301 = vmatpush.msrb.mxu0 %v566_v23  ;;  %168 = vmatpush.msra.mxu1 %v167_v49 }
  0x27   :  { %429 = vmatpush.msrb.mxu2 %v564_v22  ;;  %446 = vmatpush.msrb.mxu3 %v524_v4  ;;  %v71_v22 = vsub.f32 %v69_v51, %v70_v56 }
  0x28   :  { %305 = vmatpush.msrb.mxu0 %v568_v24  ;;  %174 = vmatpush.msra.mxu1 %v173_v53 }
  0x29   :  { %430 = vmatpush.msrb.mxu2 %v566_v23  ;;  %447 = vmatpush.msrb.mxu3 %v526_v5  ;;  %v77_v23 = vsub.f32 %v17_v55, %v706_v59 }
  0x2a   :  { %309 = vmatpush.msrb.mxu0 %v575_v27  ;;  %180 = vmatpush.msra.mxu1 %v179_v54 }
  0x2b   :  { %431 = vmatpush.msrb.mxu2 %v568_v24  ;;  %448 = vmatpush.msrb.mxu3 %v537_v9 }
  0x2c   :  { %313 = vmatpush.msrb.mxu0 %v584_v33  ;;  %368 = vmatpush.msrb.mxu1 %v522_v3  ;;  %v72_v3 = vand.u32 4294901760, %v71_v22 }
  0x2d   :  { %432 = vmatpush.msrb.mxu2 %v575_v27  ;;  %449 = vmatpush.msrb.mxu3 %v539_v10 }
  0x2e   :  { %317 = vmatpush.msrb.mxu0 %v595_v40  ;;  %370 = vmatpush.msrb.mxu1 %v524_v4  ;;  %v78_v4 = vand.u32 4294901760, %v77_v23 }
  0x2f   :  { %433 = vmatpush.msrb.mxu2 %v584_v33  ;;  %450 = vmatpush.msrb.mxu3 %v541_v11 }
  0x30   :  { %321 = vmatpush.msrb.mxu0 %v598_v41  ;;  %372 = vmatpush.msrb.mxu1 %v526_v5  ;;  %v79_v5 = vsub.f32 %v77_v23, %v78_v4 }
  0x31   :  { %434 = vmatpush.msrb.mxu2 %v595_v40  ;;  %73 = vmatmul.f32.vlgmr.msra.gmra.mxu0 %v72_v3 }
  0x32   :  { %325 = vmatpush.msrb.mxu0 %v609_v47  ;;  %374 = vmatpush.msrb.mxu1 %v537_v9  ;;  %v80_v9 = vand.u32 4294901760, %v79_v5 }
  0x33   :  { %435 = vmatpush.msrb.mxu2 %v598_v41  ;;  %451 = vmatpush.msrb.mxu3 %v554_v17 }
  0x34   :  { %376 = vmatpush.msrb.mxu1 %v539_v10  ;;  %329 = vmatpush.msrb.mxu0 %v628_v58 }
  0x35   :  { %436 = vmatpush.msrb.mxu2 %v609_v47  ;;  %452 = vmatpush.msrb.mxu3 %v561_v21 }
  0x36   :  { %240 = vmatmul.f32.vlgmr.msra.gmra.mxu2 %v69_v51  ;;  %333 = vmatpush.msrb.mxu0 %v639_v0 }
  0x37   :  { %437 = vmatpush.msrb.mxu2 %v628_v58  ;;  %378 = vmatpush.msrb.mxu1 %v541_v11 }
  0x38   :  { %284 = vmatmul.f32.vlgmr.msra.gmra.mxu3 %v70_v56  ;;  %337 = vmatpush.msrb.mxu0 %v650_v12 }
  0x39   :  { %438 = vmatpush.msrb.mxu2 %v639_v0  ;;  %380 = vmatpush.msrb.mxu1 %v554_v17 }
  0x3a   :  { %453 = vmatpush.msrb.mxu3 %v578_v29  ;;  %182 = vmatmul.f32.vlgmr.msra.gmra.mxu1 %v686_v44 }
  0x3b   :  { %439 = vmatpush.msrb.mxu2 %v650_v12  ;;  %341 = vmatpush.msrb.mxu0 %v658_v18 }
  0x3c   :  { %382 = vmatpush.msrb.mxu1 %v561_v21  ;;  %454 = vmatpush.msrb.mxu3 %v588_v35  ;;  %v35_v21 = vstv %s779_s2  ;;  %s417_s2 = sshll.u32 %s780_s3, 4  ;;  %s418_s2 = int_to_ptr.hbm [resolvable:$true] %s417_s2 }
  0x3d   :  { %81 = vmatmul.f32.gmra.mxu0 %v80_v9  ;;  %440 = vmatpush.msrb.mxu2 %v658_v18 }
  0x3e   :  { %345 = vmatpush.msrb.mxu0 %v664_v26  ;;  %384 = vmatpush.msrb.mxu1 %v578_v29 }
  0x3f   :  { %455 = vmatpush.msrb.mxu3 %v606_v46  ;;  %245 = vmatmul.f32.gmra.mxu2 %v77_v23 }
  0x40   :  { %441 = vmatpush.msrb.mxu2 %v664_v26  ;;  %349 = vmatpush.msrb.mxu0 %v670_v32 }
  0x41   :  { %386 = vmatpush.msrb.mxu1 %v588_v35  ;;  %456 = vmatpush.msrb.mxu3 %v617_v52 }
  0x42   :  { %290 = vmatmul.f32.gmra.mxu3 %v78_v4  ;;  %442 = vmatpush.msrb.mxu2 %v670_v32 }
  0x43   :  { %353 = vmatpush.msrb.mxu0 %v675_v37  ;;  %388 = vmatpush.msrb.mxu1 %v606_v46 }
  0x44   :  { %457 = vmatpush.msrb.mxu3 %v626_v57  ;;  %186 = vmatmul.f32.gmra.mxu1 %v706_v59 }
  0x45   :  { %443 = vmatpush.msrb.mxu2 %v675_v37  ;;  %357 = vmatpush.msrb.mxu0 %v683_v43 }
  0x46   :  { %390 = vmatpush.msrb.mxu1 %v617_v52  ;;  %458 = vmatpush.msrb.mxu3 %v637_v63 }
  0x47   :  { %359 = vmatmul.f32.vlgmr.msrb.gmra.mxu0 %v686_v44  ;;  %444 = vmatpush.msrb.mxu2 %v683_v43 }
  0x48   :  { %392 = vmatpush.msrb.mxu1 %v626_v57  ;;  %459 = vmatpush.msrb.mxu3 %v648_v8 }
  0x49   :  { %363 = vmatmul.f32.vlgmr.msrb.gmra.mxu2 %v706_v59 }
  0x4a   :  { %394 = vmatpush.msrb.mxu1 %v637_v63  ;;  %460 = vmatpush.msrb.mxu3 %v656_v16 }
  0x4b   :  { %404 = vmatmul.f32.vlgmr.msrb.gmra.mxu3 %v706_v59 }
  0x4c   :  { %396 = vmatpush.msrb.mxu1 %v648_v8 }
  0x4e   :  { %398 = vmatpush.msrb.mxu1 %v656_v16 }
  0x4f   :  { %400 = vmatmul.f32.vlgmr.msrb.gmra.mxu1 %v686_v44 }
  0xae   :  { %v74_v10 = vpop.f32.mrf.mxu0 }
  0xaf   :  { %v75_v27 = vadd.f32 %v74_v10, %v35_v21 }
  0xb7   :  { %v183_v11 = vpop.f32.mrf.mxu1 }
  0xb8   :  { %v184_v35 = vadd.f32 %v183_v11, %v75_v27 }
  0xb9   :  { %v241_v17 = vpop.f32.mrf.mxu2 }
  0xba   :  { %v82_v29 = vpop.f32.mrf.mxu0  ;;  %v242_v47 = vadd.f32 %v241_v17, %v184_v35 }
  0xbb   :  { %v285_v24 = vpop.f32.mrf.mxu3  ;;  %v83_v33 = vadd.f32 %v82_v29, %v35_v21 }
  0xbc   :  { %v286_v60 = vadd.f32 %v285_v24, %v242_v47 }
  0xc1   :  { %v187_v40 = vpop.f32.mrf.mxu1 }
  0xc2   :  { %v246_v41 = vpop.f32.mrf.mxu2  ;;  %v188_v46 = vadd.f32 %v187_v40, %v83_v33 }
  0xc4   :  { %v247_v57 = vadd.f32 %v246_v41, %v188_v46  ;;  %v360_v58 = vpop.f32.mrf.mxu0 }
  0xc5   :  { %v291_v52 = vpop.f32.mrf.mxu3  ;;  %v361_v61 = vadd.f32 %v360_v58, %v286_v60 }
  0xc6   :  { %v292_v62 = vadd.f32 %v291_v52, %v247_v57 }
  0xcc   :  { %v364_v63 = vpop.f32.mrf.mxu2  ;;  %v401_v0 = vpop.f32.mrf.mxu1 }
  0xcd   :  { %v365_v1 = vadd.f32 %v364_v63, %v292_v62  ;;  %v402_v2 = vadd.f32 %v401_v0, %v361_v61 }
  0xce   :  { %v405_v6 = vpop.f32.mrf.mxu3 }
  0xcf   :  { %409 = vst.msk [vmem:[#allocation3] sm:$0xff] %vm408_vm0, %v402_v2  ;;  %v406_v7 = vadd.f32 %v405_v6, %v365_v1 }
  0xd1   :  { %410 = vst.msk [vmem:[#allocation3 + $0x8] sm:$0xff] %vm408_vm0, %v406_v7 }
  0xd2   :  { %423 = dma.vmem_to_hbm [thread:$0]  %s416_s22, 256, %s418_s2, [#allocation4], %s491_s25, %s491_s25, %s492_s26  }
  0xd3   :  { %488 = dma.done.wait [#allocation4], 256  }
  0xd4   :  { %489 = vsyncadd [#allocation4], 4294967040 }
  0xd5   :  { %428 = vsyncpa [#allocation4], 1 }

</bundles_post_ra>
